<compile_context>
chip_gen: v7x
topology: tpu7x:2x2x1
jax: 0.10.0
libtpu: 0.0.40
codegen_flags: <defaults>
</compile_context>

<pallas_src>
import jax
import jax.numpy as jnp
from jax.experimental import pallas as pl
from jax.experimental.pallas import tpu as pltpu


def _mlp_kernel(x_ref, w1_ref, b1_ref, w2_ref, b2_ref, w3_ref, b3_ref, o_ref):
    # x arrives as f32; cast to bf16 for the MXU (VPU slots are far from saturated here).
    x = x_ref[...].astype(jnp.bfloat16)
    # fc1 + ReLU  (bf16 matmul, f32 accumulate / elementwise)
    h1 = jnp.dot(x, w1_ref[...], preferred_element_type=jnp.float32)
    h1 = jnp.maximum(h1 + b1_ref[...], 0.0)
    # fc2 + ReLU
    h2 = jnp.dot(h1.astype(jnp.bfloat16), w2_ref[...],
                 preferred_element_type=jnp.float32)
    h2 = jnp.maximum(h2 + b2_ref[...], 0.0)
    # fc3 (no gate)
    out = jnp.dot(h2.astype(jnp.bfloat16), w3_ref[...],
                  preferred_element_type=jnp.float32) + b3_ref[...]
    o_ref[...] = out.astype(o_ref.dtype)


def _round_up(n, m):
    return ((n + m - 1) // m) * m


def prepare_params(params):
    """One-time parameter prep (hoisted out of the hot path).

    Weights -> bf16 (MXU-native), biases stay f32. No lane padding: BlockSpec
    allows last block dims equal to the full array dims.
    """
    return {
        "w1": params["w1"].astype(jnp.bfloat16),
        "b1": params["b1"].astype(jnp.float32),
        "w2": params["w2"].astype(jnp.bfloat16),
        "b2": params["b2"].astype(jnp.float32),
        "w3": params["w3"].astype(jnp.bfloat16),
        "b3": params["b3"].astype(jnp.float32),
    }


def linear_fc_body(x, prepared, *, block_m=4096):
    """Fused 3-layer MLP forward pass.

    x: (B, state_dim) float32
    prepared: output of prepare_params (bf16 weights, f32 biases, unpadded)
    returns: (B, action_dim) float32
    """
    B, S = x.shape
    H1 = prepared["w1"].shape[1]
    H2 = prepared["w2"].shape[1]
    A = prepared["w3"].shape[1]

    # Batch tiling: aim for >= 2 grid steps (so v7x's two TensorCores both work),
    # capped at block_m and rounded to the f32 sublane granularity (8).
    tm = min(block_m, max(8, _round_up(pl.cdiv(B, 2), 8)))
    Bp = _round_up(B, tm)
    if Bp != B:
        x = jnp.pad(x, ((0, Bp - B), (0, 0)))

    grid = (Bp // tm,)
    resident = lambda i: (0, 0)  # weights/biases pinned in VMEM across the grid

    out = pl.pallas_call(
        _mlp_kernel,
        out_shape=jax.ShapeDtypeStruct((Bp, A), jnp.float32),
        grid=grid,
        in_specs=[
            pl.BlockSpec((tm, S), lambda i: (i, 0)),   # x tile, streamed
            pl.BlockSpec((S, H1), resident),
            pl.BlockSpec((1, H1), resident),
            pl.BlockSpec((H1, H2), resident),
            pl.BlockSpec((1, H2), resident),
            pl.BlockSpec((H2, A), resident),
            pl.BlockSpec((1, A), resident),
        ],
        out_specs=pl.BlockSpec((tm, A), lambda i: (i, 0)),
        compiler_params=pltpu.CompilerParams(
            dimension_semantics=("parallel",),
        ),
    )(x, prepared["w1"], prepared["b1"], prepared["w2"], prepared["b2"],
      prepared["w3"], prepared["b3"])

    return out[:B]


def init_params(key, state_dim, action_dim, hidden_units=(64, 64)):
    """Deterministic init mimicking PyTorch nn.Linear default U(-1/sqrt(fan_in), ...)."""
    h1, h2 = hidden_units
    ks = jax.random.split(key, 6)

    def lin(kw, kb, fan_in, fan_out):
        bound = 1.0 / jnp.sqrt(jnp.float32(fan_in))
        w = jax.random.uniform(kw, (fan_in, fan_out), jnp.float32, -bound, bound)
        b = jax.random.uniform(kb, (1, fan_out), jnp.float32, -bound, bound)
        return w, b

    w1, b1 = lin(ks[0], ks[1], state_dim, h1)
    w2, b2 = lin(ks[2], ks[3], h1, h2)
    w3, b3 = lin(ks[4], ks[5], h2, action_dim)
    return {"w1": w1, "b1": b1, "w2": w2, "b2": b2, "w3": w3, "b3": b3}


def reference_forward(x, p):
    h1 = jnp.maximum(x @ p["w1"] + p["b1"], 0.0)
    h2 = jnp.maximum(h1 @ p["w2"] + p["b2"], 0.0)
    return h2 @ p["w3"] + p["b3"]


if __name__ == "__main__":
    key = jax.random.PRNGKey(0)
    k_params, k_x, k_x2 = jax.random.split(key, 3)

    batch, state_dim, action_dim = 8, 16, 8
    hidden_units = (64, 64)

    params = init_params(k_params, state_dim, action_dim, hidden_units)
    prepared = prepare_params(params)  # one-time bf16 weight prep, off the hot path

    # Small batch (single grid step).
    x = jax.random.normal(k_x, (batch, state_dim), jnp.float32)
    out = jax.block_until_ready(linear_fc_body(x, prepared))
    ref = reference_forward(x, params)
    assert out.shape == (batch, action_dim)
    # bf16 matmul inputs -> loosen tolerance vs f32 reference.
    assert jnp.allclose(out, ref, atol=3e-2, rtol=3e-2), float(jnp.max(jnp.abs(out - ref)))

    # Larger, non-tile-multiple batch exercising the multi-step grid + batch padding path.
    x2 = jax.random.normal(k_x2, (300, state_dim), jnp.float32)
    out2 = jax.block_until_ready(linear_fc_body(x2, prepared, block_m=128))
    ref2 = reference_forward(x2, params)
    assert out2.shape == (300, action_dim)
    assert jnp.allclose(out2, ref2, atol=3e-2, rtol=3e-2), float(jnp.max(jnp.abs(out2 - ref2)))

    print("KERNEL_OK")
</pallas_src>

<mosaic_0001>
module attributes {stable_mosaic.version = 11 : i64} {
  func.func @_mlp_kernel(%arg0: i32, %arg1: memref<8x16xf32, #tpu.memory_space<vmem>>, %arg2: memref<16x64xbf16, #tpu.memory_space<vmem>>, %arg3: memref<1x64xf32, #tpu.memory_space<vmem>>, %arg4: memref<64x64xbf16, #tpu.memory_space<vmem>>, %arg5: memref<1x64xf32, #tpu.memory_space<vmem>>, %arg6: memref<64x8xbf16, #tpu.memory_space<vmem>>, %arg7: memref<1x8xf32, #tpu.memory_space<vmem>>, %arg8: memref<8x8xf32, #tpu.memory_space<vmem>>) attributes {dimension_semantics = [#tpu.dimension_semantics<parallel>], iteration_bounds = array<i64: 1>, scalar_prefetch = 0 : i64, scratch_operands = 0 : i64, tpu.core_type = #tpu.core_type<tc>, window_params = [{transform_indices = @transform_0, window_bounds = array<i64: 8, 16>}, {pipeline_mode = #tpu.pipeline_mode<synchronous>, transform_indices = @transform_1, window_bounds = array<i64: 16, 64>}, {pipeline_mode = #tpu.pipeline_mode<synchronous>, transform_indices = @transform_2, window_bounds = array<i64: 1, 64>}, {pipeline_mode = #tpu.pipeline_mode<synchronous>, transform_indices = @transform_3, window_bounds = array<i64: 64, 64>}, {pipeline_mode = #tpu.pipeline_mode<synchronous>, transform_indices = @transform_4, window_bounds = array<i64: 1, 64>}, {pipeline_mode = #tpu.pipeline_mode<synchronous>, transform_indices = @transform_5, window_bounds = array<i64: 64, 8>}, {pipeline_mode = #tpu.pipeline_mode<synchronous>, transform_indices = @transform_6, window_bounds = array<i64: 1, 8>}, {transform_indices = @transform_7, window_bounds = array<i64: 8, 8>}]} {
    %c0 = arith.constant 0 : index
    %c0_0 = arith.constant 0 : index
    %0 = vector.load %arg1[%c0, %c0_0] : memref<8x16xf32, #tpu.memory_space<vmem>>, vector<8x16xf32>
    %1 = arith.truncf %0 : vector<8x16xf32> to vector<8x16xbf16>
    %c0_1 = arith.constant 0 : index
    %c0_2 = arith.constant 0 : index
    %2 = vector.load %arg2[%c0_1, %c0_2] : memref<16x64xbf16, #tpu.memory_space<vmem>>, vector<16x64xbf16>
    %cst = arith.constant dense<0.000000e+00> : vector<8x64xf32>
    %3 = tpu.matmul %1, %2, %cst {dimension_numbers = #tpu.dot_dimension_numbers<[1], [0], [0], [1], [0, 0, 1, 1], [], []>} : vector<8x16xbf16>, vector<16x64xbf16>, vector<8x64xf32> -> vector<8x64xf32>
    %c0_3 = arith.constant 0 : index
    %c0_4 = arith.constant 0 : index
    %4 = vector.load %arg3[%c0_3, %c0_4] : memref<1x64xf32, #tpu.memory_space<vmem>>, vector<1x64xf32>
    %5 = vector.broadcast %4 : vector<1x64xf32> to vector<8x64xf32>
    %6 = arith.addf %3, %5 : vector<8x64xf32>
    %cst_5 = arith.constant 0.000000e+00 : f32
    %7 = vector.broadcast %cst_5 : f32 to vector<8x64xf32>
    %8 = arith.maximumf %6, %7 : vector<8x64xf32>
    %9 = arith.truncf %8 : vector<8x64xf32> to vector<8x64xbf16>
    %c0_6 = arith.constant 0 : index
    %c0_7 = arith.constant 0 : index
    %10 = vector.load %arg4[%c0_6, %c0_7] : memref<64x64xbf16, #tpu.memory_space<vmem>>, vector<64x64xbf16>
    %cst_8 = arith.constant dense<0.000000e+00> : vector<8x64xf32>
    %11 = tpu.matmul %9, %10, %cst_8 {dimension_numbers = #tpu.dot_dimension_numbers<[1], [0], [0], [1], [0, 0, 1, 1], [], []>} : vector<8x64xbf16>, vector<64x64xbf16>, vector<8x64xf32> -> vector<8x64xf32>
    %c0_9 = arith.constant 0 : index
    %c0_10 = arith.constant 0 : index
    %12 = vector.load %arg5[%c0_9, %c0_10] : memref<1x64xf32, #tpu.memory_space<vmem>>, vector<1x64xf32>
    %13 = vector.broadcast %12 : vector<1x64xf32> to vector<8x64xf32>
    %14 = arith.addf %11, %13 : vector<8x64xf32>
    %cst_11 = arith.constant 0.000000e+00 : f32
    %15 = vector.broadcast %cst_11 : f32 to vector<8x64xf32>
    %16 = arith.maximumf %14, %15 : vector<8x64xf32>
    %17 = arith.truncf %16 : vector<8x64xf32> to vector<8x64xbf16>
    %c0_12 = arith.constant 0 : index
    %c0_13 = arith.constant 0 : index
    %18 = vector.load %arg6[%c0_12, %c0_13] : memref<64x8xbf16, #tpu.memory_space<vmem>>, vector<64x8xbf16>
    %cst_14 = arith.constant dense<0.000000e+00> : vector<8x8xf32>
    %19 = tpu.matmul %17, %18, %cst_14 {dimension_numbers = #tpu.dot_dimension_numbers<[1], [0], [0], [1], [0, 0, 1, 1], [], []>} : vector<8x64xbf16>, vector<64x8xbf16>, vector<8x8xf32> -> vector<8x8xf32>
    %c0_15 = arith.constant 0 : index
    %c0_16 = arith.constant 0 : index
    %20 = vector.load %arg7[%c0_15, %c0_16] : memref<1x8xf32, #tpu.memory_space<vmem>>, vector<1x8xf32>
    %21 = vector.broadcast %20 : vector<1x8xf32> to vector<8x8xf32>
    %22 = arith.addf %19, %21 : vector<8x8xf32>
    %c0_17 = arith.constant 0 : index
    %c0_18 = arith.constant 0 : index
    %23 = vector.load %arg8[%c0_17, %c0_18] : memref<8x8xf32, #tpu.memory_space<vmem>>, vector<8x8xf32>
    tpu.vector_store %arg8[%c0_17, %c0_18], %22 {strides = array<i32>} : memref<8x8xf32, #tpu.memory_space<vmem>>, vector<8x8xf32>,
    return
  }
  func.func @transform_0(%arg0: i32) -> (i32, i32) {
    %c0_i32 = arith.constant 0 : i32
    %c0_i32_0 = arith.constant 0 : i32
    return %arg0, %c0_i32 : i32, i32
  }
  func.func @transform_1(%arg0: i32) -> (i32, i32) {
    %c0_i32 = arith.constant 0 : i32
    %c0_i32_0 = arith.constant 0 : i32
    %c0_i32_1 = arith.constant 0 : i32
    return %c0_i32, %c0_i32_0 : i32, i32
  }
  func.func @transform_2(%arg0: i32) -> (i32, i32) {
    %c0_i32 = arith.constant 0 : i32
    %c0_i32_0 = arith.constant 0 : i32
    %c0_i32_1 = arith.constant 0 : i32
    return %c0_i32, %c0_i32_0 : i32, i32
  }
  func.func @transform_3(%arg0: i32) -> (i32, i32) {
    %c0_i32 = arith.constant 0 : i32
    %c0_i32_0 = arith.constant 0 : i32
    %c0_i32_1 = arith.constant 0 : i32
    return %c0_i32, %c0_i32_0 : i32, i32
  }
  func.func @transform_4(%arg0: i32) -> (i32, i32) {
    %c0_i32 = arith.constant 0 : i32
    %c0_i32_0 = arith.constant 0 : i32
    %c0_i32_1 = arith.constant 0 : i32
    return %c0_i32, %c0_i32_0 : i32, i32
  }
  func.func @transform_5(%arg0: i32) -> (i32, i32) {
    %c0_i32 = arith.constant 0 : i32
    %c0_i32_0 = arith.constant 0 : i32
    %c0_i32_1 = arith.constant 0 : i32
    return %c0_i32, %c0_i32_0 : i32, i32
  }
  func.func @transform_6(%arg0: i32) -> (i32, i32) {
    %c0_i32 = arith.constant 0 : i32
    %c0_i32_0 = arith.constant 0 : i32
    %c0_i32_1 = arith.constant 0 : i32
    return %c0_i32, %c0_i32_0 : i32, i32
  }
  func.func @transform_7(%arg0: i32) -> (i32, i32) {
    %c0_i32 = arith.constant 0 : i32
    %c0_i32_0 = arith.constant 0 : i32
    return %arg0, %c0_i32 : i32, i32
  }
}

</mosaic_0001>

<bundles_post_ra>
// kernel: tpu_custom_call.1
= control target key start
LH: loop header
LB: loop body
LE: loop exit
PB: predicated region body
PF: predicated region fallthrough
CT: control target
= control target key end

     0   :  { %12 = vsyncpa [#allocation3], 0  ;;  %s517_s0 = inlined_call_operand.vmem [shape: f32[8,16], index: 0, kind: input, shape index: {}]   ;;  %s518_s1 = inlined_call_operand.hbm [shape: bf16[16,64], index: 1, kind: input, shape index: {}]   ;;  %s519_s2 = inlined_call_operand.vmem [shape: f32[1,64], index: 2, kind: input, shape index: {}]   ;;  %s520_s3 = inlined_call_operand.vmem [shape: bf16[64,64], index: 3, kind: input, shape index: {}]   ;;  %s521_s4 = inlined_call_operand.vmem [shape: f32[1,64], index: 4, kind: input, shape index: {}]   ;;  %s522_s5 = inlined_call_operand.vmem [shape: bf16[64,8], index: 5, kind: input, shape index: {}]   ;;  %s523_s6 = inlined_call_operand.vmem [shape: f32[1,8], index: 6, kind: input, shape index: {}]   ;;  %s524_s7 = inlined_call_operand.hbm [shape: f32[8,8], index: 7, kind: output, shape index: {}]  }
   0x1   :  { %13 = vsyncpa [#allocation4], 0  ;;  %s409_s24 = smov [#allocation2]   ;;  %s361_s28 = scalar_lea.hbm %s518_s1, 128 }
   0x2   :  { %s21_s25 = sshll.u32 %s409_s24, 4  ;;  %p362_p0 = scmp.ne.s32.totalorder %s518_s1, %s361_s28  ;;  %s22_s25 = int_to_ptr.vmem [resolvable:$true] %s21_s25 }
   0x3   :  { %p365_p1 = scmp.lt.u32.totalorder %s361_s28, %s518_s1 }
   0x5   :  { %p367_p2 = pnand %p365_p1, %p362_p0 }
   0x7   :  { %370 = shalt.err (!%p367_p2)
}
   0x8   :  { %s371_s10 = scalar_lea.vmem %s22_s25, 128  ;;  %p376_p4 = scmp.lt.s32.totalorder %s22_s25, %s22_s25 }
   0x9   :  { %p372_p3 = scmp.ne.s32.totalorder %s22_s25, %s371_s10  ;;  %p377_p5 = scmp.lt.s32.totalorder %s371_s10, %s371_s10 }
   0xb   :  { %p378_p6 = por %p377_p5, %p376_p4 }
   0xd   :  { %p379_p7 = pnand %p378_p6, %p372_p3 }
   0xf   :  { %382 = shalt.err (!%p379_p7)
}
  0x10   :  { %s410_s11 = smov 64   ;;  %s411_s12 = smov 4  }
  0x11   :  { %27 = dma.hbm_to_vmem [thread:$0]  %s518_s1, 128, %s22_s25, [#allocation3], %s410_s11, %s410_s11, %s411_s12  }
  0x12   :  { %405 = dma.done.wait [#allocation3], 128  }
  0x13   :  { %406 = vsyncadd [#allocation3], 4294967168  ;;  %v412_v0 = vmov 0.0   ;;  %vm413_vm0 = vmmov 0   ;;  %v352_v1 = vld [vmem:[#allocation2] sm:$0xff]   ;;  %vm59_vm1 = vcmask 130048  }
  0x14   :  { %316 = vmatprep.subr.bf16.mxu0 %v412_v0  ;;  %318 = vmatprep.mubr.msk.bf16.mxu0 %vm413_vm0, %v412_v0  ;;  %v42_v2 = vld [vmem:[%s517_s0] sm:$0xff]  ;;  %v354_v5 = vld [vmem:[%s520_s3 + $0x8] sm:$0xff]   ;;  %v355_v6 = vld [vmem:[%s520_s3 + $0x10] sm:$0xff]   ;;  %vm144_vm2 = vcmask 523264   ;;  %s414_s12 = smov [#allocation5]   ;;  %vm272_vm3 = vcmask 64512  }
  0x15   :  { %322 = vmatprep.subr.bf16.mxu1 %v412_v0  ;;  %330 = vmatprep.mubr.msk.bf16.mxu1 %vm413_vm0, %v412_v0  ;;  %v43_v3 = vpack.c.bf16 %v42_v2, %v42_v2  ;;  %v353_v4 = vld [vmem:[%s520_s3] sm:$0xff]   ;;  %v356_v7 = vld [vmem:[%s520_s3 + $0x18] sm:$0xff]   ;;  %v358_v9 = vld [vmem:[%s522_s5 + $0x8] sm:$0xff]  }
  0x16   :  { %317 = vmatpush3.bf16.msra.mxu0 %v352_v1  ;;  %323 = vmatpush3.bf16.msra.mxu1 %v353_v4  ;;  %v357_v8 = vld [vmem:[%s522_s5] sm:$0xff]   ;;  %v359_v18 = vld [vmem:[%s522_s5 + $0x10] sm:$0xff]   ;;  %v360_v19 = vld [vmem:[%s522_s5 + $0x18] sm:$0xff]   ;;  %s280_s5 = sshll.u32 %s414_s12, 4  ;;  %s281_s5 = int_to_ptr.vmem [resolvable:$true] %s280_s5 }
  0x17   :  { %334 = vmatprep.subr.bf16.mxu0 %v412_v0  ;;  %324 = vmatprep.subr.bf16.mxu1 %v412_v0  ;;  %v289_v10 = vld [vmem:[%s519_s2] ss:$0 sm:$0xff]  ;;  %p388_p9 = scmp.lt.s32.totalorder %s281_s5, %s281_s5 }
  0x18   :  { %v292_v20 = vld [vmem:[%s521_s4] ss:$0 sm:$0xff]  ;;  %s383_s4 = scalar_lea.vmem %s281_s5, 128 }
  0x19   :  { %319 = vmatmul.mubr.msk.bf16.vlgmr.msra.gmra.mrb[0].mxu0 %vm59_vm1, %v43_v3  ;;  %v298_v28 = vld [vmem:[%s523_s6] ss:$0 sm:$0xff]  ;;  %p384_p8 = scmp.ne.s32.totalorder %s281_s5, %s383_s4  ;;  %p389_p10 = scmp.lt.s32.totalorder %s383_s4, %s383_s4 }
  0x1a   :  { %342 = vmatprep.mubr.msk.bf16.mxu0 %vm413_vm0, %v412_v0  ;;  %325 = vmatpush3.bf16.msra.mxu1 %v354_v5 }
  0x1b   :  { %326 = vmatprep.subr.bf16.mxu1 %v412_v0  ;;  %335 = vmatpush3.bf16.msra.mxu0 %v357_v8  ;;  %p390_p11 = por %p389_p10, %p388_p9 }
  0x1c   :  { %336 = vmatprep.subr.bf16.mxu0 %v412_v0 }
  0x1d   :  { %p391_p12 = pnand %p390_p11, %p384_p8 }
  0x1e   :  { %327 = vmatpush3.bf16.msra.mxu1 %v355_v6 }
  0x1f   :  { %328 = vmatprep.subr.bf16.mxu1 %v412_v0  ;;  %337 = vmatpush3.bf16.msra.mxu0 %v358_v9 }
  0x20   :  { %338 = vmatprep.subr.bf16.mxu0 %v412_v0 }
  0x22   :  { %329 = vmatpush3.bf16.msra.mxu1 %v356_v7 }
  0x23   :  { %339 = vmatpush3.bf16.msra.mxu0 %v359_v18 }
  0x24   :  { %340 = vmatprep.subr.bf16.mxu0 %v412_v0 }
  0x27   :  { %341 = vmatpush3.bf16.msra.mxu0 %v360_v19 }
  0xec   :  { %v97_v11 = vpop.f32.mrb[0].mxu0 }
  0xed   :  { %v98_v12 = vadd.f32 %v289_v10, %v97_v11  ;;  %v320_v13 = vpop.f32.mrb[1].mxu0 }
  0xee   :  { %v100_v14 = vpop.f32.mrb[2].mxu0 }
  0xef   :  { %v103_v15 = vmax.f32 %v98_v12, 0.0  ;;  %v321_v16 = vpop.f32.mrb[3].mxu0 }
  0xf1   :  { %v104_v17 = vpack.c.bf16 %v103_v15, %v103_v15 }
  0xf3   :  { %331 = vmatmul.mubr.msk.bf16.vlgmr.msra.gmra.mrb[0].mxu1 %vm144_vm2, %v104_v17 }
 0x1c6   :  { %v182_v21 = vpop.f32.mrb[0].mxu1 }
 0x1c7   :  { %v183_v22 = vadd.f32 %v292_v20, %v182_v21  ;;  %v332_v23 = vpop.f32.mrb[1].mxu1 }
 0x1c8   :  { %v185_v24 = vpop.f32.mrb[2].mxu1 }
 0x1c9   :  { %v188_v25 = vmax.f32 %v183_v22, 0.0  ;;  %v333_v26 = vpop.f32.mrb[3].mxu1 }
 0x1cb   :  { %v189_v27 = vpack.c.bf16 %v188_v25, %v188_v25 }
 0x1cd   :  { %343 = vmatmul.mubr.msk.bf16.vlgmr.msra.gmra.mrb[4].mxu0 %vm144_vm2, %v189_v27 }
 0x2a0   :  { %v266_v29 = vpop.f32.mrb[4].mxu0 }
 0x2a1   :  { %v267_v30 = vadd.f32 %v298_v28, %v266_v29  ;;  %v344_v31 = vpop.f32.mrb[5].mxu0 }
 0x2a2   :  { %v269_v32 = vpop.f32.mrb[6].mxu0 }
 0x2a3   :  { %v345_v33 = vpop.f32.mrb[7].mxu0  ;;  %273 = vst.msk [vmem:[#allocation5] sm:$0xff] %vm272_vm3, %v267_v30 }
 0x2a4   :  { %394 = shalt.err (!%p391_p12)
}
 0x2a5   :  { %s395_s6 = scalar_lea.hbm %s524_s7, 128 }
 0x2a6   :  { %p396_p13 = scmp.ne.s32.totalorder %s524_s7, %s395_s6  ;;  %p399_p0 = scmp.lt.u32.totalorder %s395_s6, %s524_s7 }
 0x2a8   :  { %p401_p1 = pnand %p399_p0, %p396_p13 }
 0x2aa   :  { %404 = shalt.err (!%p401_p1)
}
 0x2ab   :  { %283 = dma.vmem_to_hbm [thread:$0]  %s281_s5, 128, %s524_s7, [#allocation4]  }
 0x2ac   :  { %407 = dma.done.wait [#allocation4], 128  }
 0x2ad   :  { %408 = vsyncadd [#allocation4], 4294967168 }
 0x2ae   :  { %287 = vsyncpa [#allocation3], 1 }
 0x2af   :  { %288 = vsyncpa [#allocation4], 1 }

</bundles_post_ra>
